<compile_context>
chip_gen: v6e
topology: v6e:2x2x1
jax: 0.10.0
libtpu: 0.0.40
codegen_flags: <defaults>
</compile_context>

<pallas_src>
import functools
import math

import jax
import jax.numpy as jnp
from jax.experimental import pallas as pl
from jax.experimental.pallas import tpu as pltpu

LN_EPS = 1e-5
NEG_INF = -1e30
VMEM_LIMIT_BYTES = 64 * 1024 * 1024   # <= v7x physical VMEM; ample on v5e/v6e


# ---------------------------------------------------------------------------
# In-kernel helpers
# ---------------------------------------------------------------------------
def _recip(x, exact):
    # EUP reciprocal; approx=True when we are on the fast (bf16) path.
    if hasattr(pl, "reciprocal"):
        return pl.reciprocal(x, approx=not exact)
    return 1.0 / x


def _gelu(x, exact):
    if exact:
        return 0.5 * x * (1.0 + jax.lax.erf(x * (1.0 / math.sqrt(2.0))))
    # tanh-approx GELU: transcendental goes to the otherwise-idle EUP slot.
    return jax.nn.gelu(x, approximate=True)


def _layernorm(x, w, b, eps=LN_EPS):
    mu = jnp.mean(x, axis=-1, keepdims=True)
    var = jnp.mean((x - mu) ** 2, axis=-1, keepdims=True)
    return (x - mu) * jax.lax.rsqrt(var + eps) * w + b


def _mha(xn, wqkv, num_heads, dtype, bias, exact):
    """Multi-head self-attention over R rows.

    `wqkv` is already in the compute dtype with the attention scale folded
    into its Q columns.  `bias` (R, R) is an additive score bias; a
    block-diagonal 0/-1e30 bias packs many short independent sequences into
    one MXU-shaped block.  Heads are stacked into a single (H, R, hd) batch so
    QK^T, softmax and PV each run as one batched op (f32 accumulation).
    """
    R, C = xn.shape
    hd = C // num_heads
    qkv = jnp.dot(xn.astype(dtype), wqkv,
                  preferred_element_type=jnp.float32)          # (R, 3C) f32
    qkv = qkv.astype(dtype)                                     # cast once
    q = jnp.stack([qkv[:, h * hd:(h + 1) * hd] for h in range(num_heads)])
    k = jnp.stack([qkv[:, C + h * hd:C + (h + 1) * hd] for h in range(num_heads)])
    v = jnp.stack([qkv[:, 2 * C + h * hd:2 * C + (h + 1) * hd]
                   for h in range(num_heads)])                  # each (H, R, hd)
    s = jnp.einsum("hnd,hmd->hnm", q, k,
                   preferred_element_type=jnp.float32)          # (H, R, R)
    if bias is not None:
        s = s + bias[None]
    s = s - jnp.max(s, axis=-1, keepdims=True)
    e = jnp.exp(s)
    probs = e * _recip(jnp.sum(e, axis=-1, keepdims=True), exact)
    o = jnp.einsum("hnm,hmd->hnd", probs.astype(dtype), v,
                   preferred_element_type=jnp.float32)          # (H, R, hd)
    return jnp.concatenate([o[h] for h in range(num_heads)], axis=-1)  # (R, C)


# ---------------------------------------------------------------------------
# Kernels
# ---------------------------------------------------------------------------
def temporal_block_kernel(x_ref, bias_ref, lnw_ref, lnb_ref, wqkv_ref, wproj_ref,
                          bproj_ref, wtfc_ref, btfc_ref, o_ref,
                          *, num_heads, compute_dtype, exact):
    """Fused: LN -> temporal MHA (block-diag bias) -> proj -> temporal_fc -> +x."""
    xb = x_ref[...].astype(jnp.float32)                         # (R, C)
    xn = _layernorm(xb, lnw_ref[...], lnb_ref[...])
    attn = _mha(xn, wqkv_ref[...], num_heads, compute_dtype, bias_ref[...], exact)
    proj = jnp.dot(attn.astype(compute_dtype), wproj_ref[...],
                   preferred_element_type=jnp.float32) + bproj_ref[...]
    res = jnp.dot(proj.astype(compute_dtype), wtfc_ref[...],
                  preferred_element_type=jnp.float32) + btfc_ref[...]
    o_ref[...] = (xb + res).astype(o_ref.dtype)


def spatial_mlp_kernel(x_ref, ln1w_ref, ln1b_ref, wqkv_ref, wproj_ref, bproj_ref,
                       ln2w_ref, ln2b_ref, w1_ref, b1_ref, w2_ref, b2_ref, o_ref,
                       *, num_heads, compute_dtype, exact):
    """Fused: LN1 -> spatial MHA -> proj -> +x -> LN2 -> fc1 -> GELU -> fc2 -> +."""
    xb = x_ref[...].astype(jnp.float32)                         # (HW, C)
    xn = _layernorm(xb, ln1w_ref[...], ln1b_ref[...])
    attn = _mha(xn, wqkv_ref[...], num_heads, compute_dtype, None, exact)
    res = jnp.dot(attn.astype(compute_dtype), wproj_ref[...],
                  preferred_element_type=jnp.float32) + bproj_ref[...]
    x2 = xb + res
    xn2 = _layernorm(x2, ln2w_ref[...], ln2b_ref[...])
    h = jnp.dot(xn2.astype(compute_dtype), w1_ref[...],
                preferred_element_type=jnp.float32) + b1_ref[...]
    h = _gelu(h, exact)
    y = jnp.dot(h.astype(compute_dtype), w2_ref[...],
                preferred_element_type=jnp.float32) + b2_ref[...]
    o_ref[...] = (x2 + y).astype(o_ref.dtype)


# ---------------------------------------------------------------------------
# Pallas wrappers
# ---------------------------------------------------------------------------
def _pick_rows(hw, t, cap):
    """Tokens per temporal block: g*t with g | hw, g*t <= cap, g*t % 8 == 0."""
    best = None
    for g in range(1, hw + 1):
        r = g * t
        if hw % g == 0 and r <= cap and r % 8 == 0:
            best = r
    if best is None:
        best = hw * t            # full row dim per batch element (always legal)
    return best


def temporal_attn_fused(x, p, T, *, num_heads, compute_dtype, max_tokens=256):
    B, N, C = x.shape            # rows in 'h w t' order -> temporal seqs contiguous
    HW = N // T
    R = _pick_rows(HW, T, max_tokens)
    grid = (B, N // R)
    exact = jnp.dtype(compute_dtype) == jnp.dtype(jnp.float32)

    # Block-diagonal additive bias: token i attends token j iff i//T == j//T.
    g = jnp.arange(R, dtype=jnp.int32) // T
    bias = jnp.where(g[:, None] == g[None, :], 0.0, NEG_INF).astype(jnp.float32)

    kern = functools.partial(temporal_block_kernel, num_heads=num_heads,
                             compute_dtype=compute_dtype, exact=exact)
    wspec = lambda shape: pl.BlockSpec(shape, lambda b, i: (0,) * len(shape))
    return pl.pallas_call(
        kern,
        out_shape=jax.ShapeDtypeStruct((B, N, C), x.dtype),
        grid=grid,
        in_specs=[
            pl.BlockSpec((None, R, C), lambda b, i: (b, i, 0)),
            wspec((R, R)),                       # bias (resident)
            wspec((1, C)), wspec((1, C)),        # temporal_norm1 w, b (f32)
            wspec((C, 3 * C)),                   # qkv   (compute dtype, Q pre-scaled)
            wspec((C, C)), wspec((1, C)),        # proj
            wspec((C, C)), wspec((1, C)),        # temporal_fc
        ],
        out_specs=pl.BlockSpec((None, R, C), lambda b, i: (b, i, 0)),
        compiler_params=pltpu.CompilerParams(
            dimension_semantics=("parallel", "parallel"),
            vmem_limit_bytes=VMEM_LIMIT_BYTES),
    )(x, bias, p["tnorm_w"], p["tnorm_b"], p["t_wqkv"], p["t_wproj"], p["t_bproj"],
      p["tfc_w"], p["tfc_b"])


def spatial_mlp_fused(xs, p, *, num_heads, compute_dtype):
    B, T, HW, C = xs.shape
    Hd = p["fc1_w"].shape[1]
    exact = jnp.dtype(compute_dtype) == jnp.dtype(jnp.float32)
    kern = functools.partial(spatial_mlp_kernel, num_heads=num_heads,
                             compute_dtype=compute_dtype, exact=exact)
    wspec = lambda shape: pl.BlockSpec(shape, lambda b, t: (0,) * len(shape))
    return pl.pallas_call(
        kern,
        out_shape=jax.ShapeDtypeStruct((B, T, HW, C), xs.dtype),
        grid=(B, T),
        in_specs=[
            pl.BlockSpec((None, None, HW, C), lambda b, t: (b, t, 0, 0)),
            wspec((1, C)), wspec((1, C)),        # norm1 w, b
            wspec((C, 3 * C)),                   # spatial qkv (Q pre-scaled)
            wspec((C, C)), wspec((1, C)),        # proj
            wspec((1, C)), wspec((1, C)),        # norm2 w, b
            wspec((C, Hd)), wspec((1, Hd)),      # fc1
            wspec((Hd, C)), wspec((1, C)),       # fc2
        ],
        out_specs=pl.BlockSpec((None, None, HW, C), lambda b, t: (b, t, 0, 0)),
        compiler_params=pltpu.CompilerParams(
            dimension_semantics=("parallel", "parallel"),
            vmem_limit_bytes=VMEM_LIMIT_BYTES),
    )(xs, p["norm1_w"], p["norm1_b"], p["s_wqkv"], p["s_wproj"], p["s_bproj"],
      p["norm2_w"], p["norm2_b"], p["fc1_w"], p["fc1_b"], p["fc2_w"], p["fc2_b"])


def _prepare_params(p, num_heads, compute_dtype):
    """Pre-cast matmul weights to the compute dtype and fold the attention
    scale into the Q columns of each qkv weight (done once, outside kernels)."""
    C = p["t_wqkv"].shape[0]
    scale = (C // num_heads) ** -0.5

    def fold_scale(wqkv):
        return jnp.concatenate([wqkv[:, :C] * scale, wqkv[:, C:]], axis=1)

    q = dict(p)
    q["t_wqkv"] = fold_scale(p["t_wqkv"]).astype(compute_dtype)
    q["s_wqkv"] = fold_scale(p["s_wqkv"]).astype(compute_dtype)
    for name in ("t_wproj", "tfc_w", "s_wproj", "fc1_w", "fc2_w"):
        q[name] = p[name].astype(compute_dtype)
    return q


# ---------------------------------------------------------------------------
# Block forward (divided_space_time); dropout / drop_path = identity (eval)
# ---------------------------------------------------------------------------
def block_forward(x, p, B, T, W, *, num_heads, compute_dtype=jnp.bfloat16,
                  max_tokens=256):
    Bx, N, C = x.shape
    HW = N // T
    pp = _prepare_params(p, num_heads, compute_dtype)

    # --- temporal attention + proj + temporal_fc + residual (fused, hw-major)
    xt2 = temporal_attn_fused(x, pp, T, num_heads=num_heads,
                              compute_dtype=compute_dtype, max_tokens=max_tokens)

    # --- one XLA permute to time-major layout for the spatial branch
    xs = xt2.reshape(B, HW, T, C).transpose(0, 2, 1, 3)          # (B, T, HW, C)

    # --- spatial attention + residual + LN2 + MLP + residual (all fused)
    out = spatial_mlp_fused(xs, pp, num_heads=num_heads,
                            compute_dtype=compute_dtype)

    # --- back to 'b (h w t) m'
    return out.transpose(0, 2, 1, 3).reshape(B, N, C)


# ---------------------------------------------------------------------------
# Pure-JAX reference for verification (exact erf GELU / exact softmax)
# ---------------------------------------------------------------------------
def _ref_ln(x, w, b):
    mu = jnp.mean(x, axis=-1, keepdims=True)
    var = jnp.mean((x - mu) ** 2, axis=-1, keepdims=True)
    return (x - mu) / jnp.sqrt(var + LN_EPS) * w[0] + b[0]


def _ref_attn(x, ln_w, ln_b, wqkv, wproj, bproj, num_heads):
    Bs, N, C = x.shape
    hd = C // num_heads
    scale = hd ** -0.5
    xn = _ref_ln(x, ln_w, ln_b)
    qkv = xn @ wqkv
    qkv = qkv.reshape(Bs, N, 3, num_heads, hd).transpose(2, 0, 3, 1, 4)
    q, k, v = qkv[0], qkv[1], qkv[2]
    a = jnp.einsum("bhqd,bhkd->bhqk", q, k) * scale
    a = jax.nn.softmax(a, axis=-1)
    o = jnp.einsum("bhqk,bhkd->bhqd", a, v)
    o = o.transpose(0, 2, 1, 3).reshape(Bs, N, C)
    return o @ wproj + bproj[0]


def ref_block_forward(x, p, B, T, W, *, num_heads):
    Bx, N, C = x.shape
    H = (N // T) // W
    xt = x.reshape(B, H * W, T, C).reshape(B * H * W, T, C)
    res_t = _ref_attn(xt, p["tnorm_w"], p["tnorm_b"],
                      p["t_wqkv"], p["t_wproj"], p["t_bproj"], num_heads)
    res_t = res_t.reshape(B, N, C) @ p["tfc_w"] + p["tfc_b"][0]
    xt2 = x + res_t
    xs = xt2.reshape(B, H * W, T, C).transpose(0, 2, 1, 3).reshape(B * T, H * W, C)
    res_s = _ref_attn(xs, p["norm1_w"], p["norm1_b"],
                      p["s_wqkv"], p["s_wproj"], p["s_bproj"], num_heads)
    res_s = res_s.reshape(B, T, H * W, C).transpose(0, 2, 1, 3).reshape(B, N, C)
    x2 = xt2 + res_s
    xn = _ref_ln(x2, p["norm2_w"], p["norm2_b"])
    h = xn @ p["fc1_w"] + p["fc1_b"][0]
    h = 0.5 * h * (1.0 + jax.lax.erf(h / math.sqrt(2.0)))
    mlp_out = h @ p["fc2_w"] + p["fc2_b"][0]
    return x2 + mlp_out


# ---------------------------------------------------------------------------
# Deterministic parameter init (synthetic; no checkpoint loading)
# ---------------------------------------------------------------------------
def make_params(key, dim, mlp_ratio=4.0):
    hdim = int(dim * mlp_ratio)
    ks = jax.random.split(key, 16)
    nrm = lambda k, s: (0.02 * jax.random.normal(k, s)).astype(jnp.float32)
    return {
        # temporal attention branch
        "tnorm_w": jnp.ones((1, dim), jnp.float32) + nrm(ks[0], (1, dim)),
        "tnorm_b": nrm(ks[1], (1, dim)),
        "t_wqkv": nrm(ks[2], (dim, 3 * dim)),     # qkv_bias=False
        "t_wproj": nrm(ks[3], (dim, dim)),
        "t_bproj": nrm(ks[4], (1, dim)),
        "tfc_w": nrm(ks[5], (dim, dim)),
        "tfc_b": nrm(ks[6], (1, dim)),
        # spatial attention branch
        "norm1_w": jnp.ones((1, dim), jnp.float32) + nrm(ks[7], (1, dim)),
        "norm1_b": nrm(ks[8], (1, dim)),
        "s_wqkv": nrm(ks[9], (dim, 3 * dim)),
        "s_wproj": nrm(ks[10], (dim, dim)),
        "s_bproj": nrm(ks[11], (1, dim)),
        # MLP
        "norm2_w": jnp.ones((1, dim), jnp.float32) + nrm(ks[12], (1, dim)),
        "norm2_b": nrm(ks[13], (1, dim)),
        "fc1_w": nrm(ks[14], (dim, hdim)),
        "fc1_b": jnp.zeros((1, hdim), jnp.float32),
        "fc2_w": nrm(ks[15], (hdim, dim)),
        "fc2_b": jnp.zeros((1, dim), jnp.float32),
    }


if __name__ == "__main__":
    B, T, H, W = 2, 4, 2, 2
    dim, num_heads = 32, 4
    N = H * W * T

    key = jax.random.PRNGKey(0)
    kx, kp = jax.random.split(key)
    x = jax.random.normal(kx, (B, N, dim), dtype=jnp.float32)
    params = make_params(kp, dim)

    ref = ref_block_forward(x, params, B, T, W, num_heads=num_heads)

    # f32 path: exact softmax reciprocal + exact erf GELU -> tight check.
    out_f32 = jax.block_until_ready(
        block_forward(x, params, B, T, W, num_heads=num_heads,
                      compute_dtype=jnp.float32))
    assert out_f32.shape == (B, N, dim)
    assert jnp.allclose(out_f32, ref, atol=1e-4, rtol=1e-4), "f32 mismatch vs reference"

    # bf16 matmul operands / f32 accumulation (default fast path) -> loose check.
    out_bf16 = jax.block_until_ready(
        block_forward(x, params, B, T, W, num_heads=num_heads,
                      compute_dtype=jnp.bfloat16))
    assert jnp.allclose(out_bf16, ref, atol=2e-2, rtol=2e-2), "bf16 mismatch vs reference"

    print("KERNEL_OK")
</pallas_src>

<mosaic_0001>
module attributes {stable_mosaic.version = 11 : i64} {
  func.func @temporal_block_kernel(%arg0: i32, %arg1: i32, %arg2: memref<1x16x32xf32, #tpu.memory_space<vmem>>, %arg3: memref<16x16xf32, #tpu.memory_space<vmem>>, %arg4: memref<1x32xf32, #tpu.memory_space<vmem>>, %arg5: memref<1x32xf32, #tpu.memory_space<vmem>>, %arg6: memref<32x96xf32, #tpu.memory_space<vmem>>, %arg7: memref<32x32xf32, #tpu.memory_space<vmem>>, %arg8: memref<1x32xf32, #tpu.memory_space<vmem>>, %arg9: memref<32x32xf32, #tpu.memory_space<vmem>>, %arg10: memref<1x32xf32, #tpu.memory_space<vmem>>, %arg11: memref<1x16x32xf32, #tpu.memory_space<vmem>>) attributes {dimension_semantics = [#tpu.dimension_semantics<parallel>, #tpu.dimension_semantics<parallel>], iteration_bounds = array<i64: 2, 1>, scalar_prefetch = 0 : i64, scratch_operands = 0 : i64, tpu.core_type = #tpu.core_type<tc>, window_params = [{transform_indices = @transform_0, window_bounds = array<i64: 1, 16, 32>}, {pipeline_mode = #tpu.pipeline_mode<synchronous>, transform_indices = @transform_1, window_bounds = array<i64: 16, 16>}, {pipeline_mode = #tpu.pipeline_mode<synchronous>, transform_indices = @transform_2, window_bounds = array<i64: 1, 32>}, {pipeline_mode = #tpu.pipeline_mode<synchronous>, transform_indices = @transform_3, window_bounds = array<i64: 1, 32>}, {pipeline_mode = #tpu.pipeline_mode<synchronous>, transform_indices = @transform_4, window_bounds = array<i64: 32, 96>}, {pipeline_mode = #tpu.pipeline_mode<synchronous>, transform_indices = @transform_5, window_bounds = array<i64: 32, 32>}, {pipeline_mode = #tpu.pipeline_mode<synchronous>, transform_indices = @transform_6, window_bounds = array<i64: 1, 32>}, {pipeline_mode = #tpu.pipeline_mode<synchronous>, transform_indices = @transform_7, window_bounds = array<i64: 32, 32>}, {pipeline_mode = #tpu.pipeline_mode<synchronous>, transform_indices = @transform_8, window_bounds = array<i64: 1, 32>}, {transform_indices = @transform_9, window_bounds = array<i64: 1, 16, 32>}]} {
    %c0 = arith.constant 0 : index
    %c0_0 = arith.constant 0 : index
    %c0_1 = arith.constant 0 : index
    %0 = vector.load %arg2[%c0, %c0_0, %c0_1] : memref<1x16x32xf32, #tpu.memory_space<vmem>>, vector<1x16x32xf32>
    %1 = vector.shape_cast %0 : vector<1x16x32xf32> to vector<16x32xf32>
    %c0_2 = arith.constant 0 : index
    %c0_3 = arith.constant 0 : index
    %2 = vector.load %arg4[%c0_2, %c0_3] : memref<1x32xf32, #tpu.memory_space<vmem>>, vector<1x32xf32>
    %c0_4 = arith.constant 0 : index
    %c0_5 = arith.constant 0 : index
    %3 = vector.load %arg5[%c0_4, %c0_5] : memref<1x32xf32, #tpu.memory_space<vmem>>, vector<1x32xf32>
    %cst = arith.constant dense<0.000000e+00> : vector<16xf32>
    %4 = vector.multi_reduction <add>, %1, %cst [1] : vector<16x32xf32> to vector<16xf32>
    %5 = vector.shape_cast %4 : vector<16xf32> to vector<16x1xf32>
    %cst_6 = arith.constant 3.200000e+01 : f32
    %6 = vector.broadcast %cst_6 : f32 to vector<16x1xf32>
    %7 = arith.divf %5, %6 : vector<16x1xf32>
    %8 = vector.broadcast %7 : vector<16x1xf32> to vector<16x32xf32>
    %9 = arith.subf %1, %8 : vector<16x32xf32>
    %10 = arith.mulf %9, %9 : vector<16x32xf32>
    %cst_7 = arith.constant dense<0.000000e+00> : vector<16xf32>
    %11 = vector.multi_reduction <add>, %10, %cst_7 [1] : vector<16x32xf32> to vector<16xf32>
    %12 = vector.shape_cast %11 : vector<16xf32> to vector<16x1xf32>
    %cst_8 = arith.constant 3.200000e+01 : f32
    %13 = vector.broadcast %cst_8 : f32 to vector<16x1xf32>
    %14 = arith.divf %12, %13 : vector<16x1xf32>
    %15 = vector.broadcast %7 : vector<16x1xf32> to vector<16x32xf32>
    %16 = arith.subf %1, %15 : vector<16x32xf32>
    %cst_9 = arith.constant 9.99999974E-6 : f32
    %17 = vector.broadcast %cst_9 : f32 to vector<16x1xf32>
    %18 = arith.addf %14, %17 : vector<16x1xf32>
    %19 = math.rsqrt %18 : vector<16x1xf32>
    %20 = vector.broadcast %19 : vector<16x1xf32> to vector<16x32xf32>
    %21 = arith.mulf %16, %20 : vector<16x32xf32>
    %22 = vector.broadcast %2 : vector<1x32xf32> to vector<16x32xf32>
    %23 = arith.mulf %21, %22 : vector<16x32xf32>
    %24 = vector.broadcast %3 : vector<1x32xf32> to vector<16x32xf32>
    %25 = arith.addf %23, %24 : vector<16x32xf32>
    %c0_10 = arith.constant 0 : index
    %c0_11 = arith.constant 0 : index
    %26 = vector.load %arg6[%c0_10, %c0_11] : memref<32x96xf32, #tpu.memory_space<vmem>>, vector<32x96xf32>
    %c0_12 = arith.constant 0 : index
    %c0_13 = arith.constant 0 : index
    %27 = vector.load %arg3[%c0_12, %c0_13] : memref<16x16xf32, #tpu.memory_space<vmem>>, vector<16x16xf32>
    %cst_14 = arith.constant dense<0.000000e+00> : vector<16x96xf32>
    %28 = tpu.matmul %25, %26, %cst_14 {dimension_numbers = #tpu.dot_dimension_numbers<[1], [0], [0], [1], [0, 0, 1, 1], [], []>} : vector<16x32xf32>, vector<32x96xf32>, vector<16x96xf32> -> vector<16x96xf32>
    %29 = vector.extract_strided_slice %28 {offsets = [0, 0], sizes = [16, 8], strides = [1, 1]} : vector<16x96xf32> to vector<16x8xf32>
    %30 = vector.extract_strided_slice %28 {offsets = [0, 8], sizes = [16, 8], strides = [1, 1]} : vector<16x96xf32> to vector<16x8xf32>
    %31 = vector.extract_strided_slice %28 {offsets = [0, 16], sizes = [16, 8], strides = [1, 1]} : vector<16x96xf32> to vector<16x8xf32>
    %32 = vector.extract_strided_slice %28 {offsets = [0, 24], sizes = [16, 8], strides = [1, 1]} : vector<16x96xf32> to vector<16x8xf32>
    %33 = vector.shape_cast %29 : vector<16x8xf32> to vector<1x16x8xf32>
    %34 = vector.shape_cast %30 : vector<16x8xf32> to vector<1x16x8xf32>
    %35 = vector.shape_cast %31 : vector<16x8xf32> to vector<1x16x8xf32>
    %36 = vector.shape_cast %32 : vector<16x8xf32> to vector<1x16x8xf32>
    %37 = tpu.concatenate %33, %34, %35, %36 in 0 : vector<1x16x8xf32>, vector<1x16x8xf32>, vector<1x16x8xf32>, vector<1x16x8xf32> -> vector<4x16x8xf32>
    %38 = vector.extract_strided_slice %28 {offsets = [0, 32], sizes = [16, 8], strides = [1, 1]} : vector<16x96xf32> to vector<16x8xf32>
    %39 = vector.extract_strided_slice %28 {offsets = [0, 40], sizes = [16, 8], strides = [1, 1]} : vector<16x96xf32> to vector<16x8xf32>
    %40 = vector.extract_strided_slice %28 {offsets = [0, 48], sizes = [16, 8], strides = [1, 1]} : vector<16x96xf32> to vector<16x8xf32>
    %41 = vector.extract_strided_slice %28 {offsets = [0, 56], sizes = [16, 8], strides = [1, 1]} : vector<16x96xf32> to vector<16x8xf32>
    %42 = vector.shape_cast %38 : vector<16x8xf32> to vector<1x16x8xf32>
    %43 = vector.shape_cast %39 : vector<16x8xf32> to vector<1x16x8xf32>
    %44 = vector.shape_cast %40 : vector<16x8xf32> to vector<1x16x8xf32>
    %45 = vector.shape_cast %41 : vector<16x8xf32> to vector<1x16x8xf32>
    %46 = tpu.concatenate %42, %43, %44, %45 in 0 : vector<1x16x8xf32>, vector<1x16x8xf32>, vector<1x16x8xf32>, vector<1x16x8xf32> -> vector<4x16x8xf32>
    %47 = vector.extract_strided_slice %28 {offsets = [0, 64], sizes = [16, 8], strides = [1, 1]} : vector<16x96xf32> to vector<16x8xf32>
    %48 = vector.extract_strided_slice %28 {offsets = [0, 72], sizes = [16, 8], strides = [1, 1]} : vector<16x96xf32> to vector<16x8xf32>
    %49 = vector.extract_strided_slice %28 {offsets = [0, 80], sizes = [16, 8], strides = [1, 1]} : vector<16x96xf32> to vector<16x8xf32>
    %50 = vector.extract_strided_slice %28 {offsets = [0, 88], sizes = [16, 8], strides = [1, 1]} : vector<16x96xf32> to vector<16x8xf32>
    %51 = vector.shape_cast %47 : vector<16x8xf32> to vector<1x16x8xf32>
    %52 = vector.shape_cast %48 : vector<16x8xf32> to vector<1x16x8xf32>
    %53 = vector.shape_cast %49 : vector<16x8xf32> to vector<1x16x8xf32>
    %54 = vector.shape_cast %50 : vector<16x8xf32> to vector<1x16x8xf32>
    %55 = tpu.concatenate %51, %52, %53, %54 in 0 : vector<1x16x8xf32>, vector<1x16x8xf32>, vector<1x16x8xf32>, vector<1x16x8xf32> -> vector<4x16x8xf32>
    "tpu.trace_start"() <{level = 10 : i32, message = "hnd,hmd->hnm"}> : () -> ()
    %cst_15 = arith.constant dense<0.000000e+00> : vector<4x16x16xf32>
    %56 = tpu.matmul %37, %46, %cst_15 {dimension_numbers = #tpu.dot_dimension_numbers<[2], [2], [1], [1], [0, 0, 0, 1, 1, 1], [0], [0]>} : vector<4x16x8xf32>, vector<4x16x8xf32>, vector<4x16x16xf32> -> vector<4x16x16xf32>
    "tpu.trace_stop"() : () -> ()
    %57 = vector.shape_cast %27 : vector<16x16xf32> to vector<1x16x16xf32>
    %58 = vector.broadcast %57 : vector<1x16x16xf32> to vector<4x16x16xf32>
    %59 = arith.addf %56, %58 : vector<4x16x16xf32>
    %cst_16 = arith.constant dense<0xFF800000> : vector<4x16xf32>
    %60 = vector.multi_reduction <maximumf>, %59, %cst_16 [2] : vector<4x16x16xf32> to vector<4x16xf32>
    %61 = vector.shape_cast %60 : vector<4x16xf32> to vector<4x16x1xf32>
    %62 = vector.broadcast %61 : vector<4x16x1xf32> to vector<4x16x16xf32>
    %63 = arith.subf %59, %62 : vector<4x16x16xf32>
    %64 = math.exp %63 : vector<4x16x16xf32>
    %cst_17 = arith.constant dense<0.000000e+00> : vector<4x16xf32>
    %65 = vector.multi_reduction <add>, %64, %cst_17 [2] : vector<4x16x16xf32> to vector<4x16xf32>
    %66 = vector.shape_cast %65 : vector<4x16xf32> to vector<4x16x1xf32>
    %67 = tpu.reciprocal %66 : vector<4x16x1xf32> -> vector<4x16x1xf32>
    %68 = vector.broadcast %67 : vector<4x16x1xf32> to vector<4x16x16xf32>
    %69 = arith.mulf %64, %68 : vector<4x16x16xf32>
    "tpu.trace_start"() <{level = 10 : i32, message = "hnm,hmd->hnd"}> : () -> ()
    %cst_18 = arith.constant dense<0.000000e+00> : vector<4x16x8xf32>
    %70 = tpu.matmul %69, %55, %cst_18 {dimension_numbers = #tpu.dot_dimension_numbers<[2], [1], [1], [2], [0, 0, 0, 1, 1, 2], [0], [0]>} : vector<4x16x16xf32>, vector<4x16x8xf32>, vector<4x16x8xf32> -> vector<4x16x8xf32>
    "tpu.trace_stop"() : () -> ()
    %71 = vector.extract_strided_slice %70 {offsets = [0, 0, 0], sizes = [1, 16, 8], strides = [1, 1, 1]} : vector<4x16x8xf32> to vector<1x16x8xf32>
    %72 = vector.shape_cast %71 : vector<1x16x8xf32> to vector<16x8xf32>
    %73 = vector.extract_strided_slice %70 {offsets = [1, 0, 0], sizes = [1, 16, 8], strides = [1, 1, 1]} : vector<4x16x8xf32> to vector<1x16x8xf32>
    %74 = vector.shape_cast %73 : vector<1x16x8xf32> to vector<16x8xf32>
    %75 = vector.extract_strided_slice %70 {offsets = [2, 0, 0], sizes = [1, 16, 8], strides = [1, 1, 1]} : vector<4x16x8xf32> to vector<1x16x8xf32>
    %76 = vector.shape_cast %75 : vector<1x16x8xf32> to vector<16x8xf32>
    %77 = vector.extract_strided_slice %70 {offsets = [3, 0, 0], sizes = [1, 16, 8], strides = [1, 1, 1]} : vector<4x16x8xf32> to vector<1x16x8xf32>
    %78 = vector.shape_cast %77 : vector<1x16x8xf32> to vector<16x8xf32>
    %79 = tpu.concatenate %72, %74, %76, %78 in 1 : vector<16x8xf32>, vector<16x8xf32>, vector<16x8xf32>, vector<16x8xf32> -> vector<16x32xf32>
    %c0_19 = arith.constant 0 : index
    %c0_20 = arith.constant 0 : index
    %80 = vector.load %arg7[%c0_19, %c0_20] : memref<32x32xf32, #tpu.memory_space<vmem>>, vector<32x32xf32>
    %cst_21 = arith.constant dense<0.000000e+00> : vector<16x32xf32>
    %81 = tpu.matmul %79, %80, %cst_21 {dimension_numbers = #tpu.dot_dimension_numbers<[1], [0], [0], [1], [0, 0, 1, 1], [], []>} : vector<16x32xf32>, vector<32x32xf32>, vector<16x32xf32> -> vector<16x32xf32>
    %c0_22 = arith.constant 0 : index
    %c0_23 = arith.constant 0 : index
    %82 = vector.load %arg8[%c0_22, %c0_23] : memref<1x32xf32, #tpu.memory_space<vmem>>, vector<1x32xf32>
    %83 = vector.broadcast %82 : vector<1x32xf32> to vector<16x32xf32>
    %84 = arith.addf %81, %83 : vector<16x32xf32>
    %c0_24 = arith.constant 0 : index
    %c0_25 = arith.constant 0 : index
    %85 = vector.load %arg9[%c0_24, %c0_25] : memref<32x32xf32, #tpu.memory_space<vmem>>, vector<32x32xf32>
    %cst_26 = arith.constant dense<0.000000e+00> : vector<16x32xf32>
    %86 = tpu.matmul %84, %85, %cst_26 {dimension_numbers = #tpu.dot_dimension_numbers<[1], [0], [0], [1], [0, 0, 1, 1], [], []>} : vector<16x32xf32>, vector<32x32xf32>, vector<16x32xf32> -> vector<16x32xf32>
    %c0_27 = arith.constant 0 : index
    %c0_28 = arith.constant 0 : index
    %87 = vector.load %arg10[%c0_27, %c0_28] : memref<1x32xf32, #tpu.memory_space<vmem>>, vector<1x32xf32>
    %88 = vector.broadcast %87 : vector<1x32xf32> to vector<16x32xf32>
    %89 = arith.addf %86, %88 : vector<16x32xf32>
    %90 = arith.addf %1, %89 : vector<16x32xf32>
    %c0_29 = arith.constant 0 : index
    %c0_30 = arith.constant 0 : index
    %c0_31 = arith.constant 0 : index
    %91 = vector.load %arg11[%c0_29, %c0_30, %c0_31] : memref<1x16x32xf32, #tpu.memory_space<vmem>>, vector<1x16x32xf32>
    %92 = vector.shape_cast %91 : vector<1x16x32xf32> to vector<16x32xf32>
    %93 = vector.shape_cast %90 : vector<16x32xf32> to vector<1x16x32xf32>
    tpu.vector_store %arg11[%c0_29, %c0_30, %c0_31], %93 {strides = array<i32>} : memref<1x16x32xf32, #tpu.memory_space<vmem>>, vector<1x16x32xf32>,
    return
  }
  func.func @transform_0(%arg0: i32, %arg1: i32) -> (i32, i32, i32) {
    %c0_i32 = arith.constant 0 : i32
    %c0_i32_0 = arith.constant 0 : i32
    return %arg0, %arg1, %c0_i32 : i32, i32, i32
  }
  func.func @transform_1(%arg0: i32, %arg1: i32) -> (i32, i32) {
    %c0_i32 = arith.constant 0 : i32
    %c0_i32_0 = arith.constant 0 : i32
    %c0_i32_1 = arith.constant 0 : i32
    return %c0_i32, %c0_i32_0 : i32, i32
  }
  func.func @transform_2(%arg0: i32, %arg1: i32) -> (i32, i32) {
    %c0_i32 = arith.constant 0 : i32
    %c0_i32_0 = arith.constant 0 : i32
    %c0_i32_1 = arith.constant 0 : i32
    return %c0_i32, %c0_i32_0 : i32, i32
  }
  func.func @transform_3(%arg0: i32, %arg1: i32) -> (i32, i32) {
    %c0_i32 = arith.constant 0 : i32
    %c0_i32_0 = arith.constant 0 : i32
    %c0_i32_1 = arith.constant 0 : i32
    return %c0_i32, %c0_i32_0 : i32, i32
  }
  func.func @transform_4(%arg0: i32, %arg1: i32) -> (i32, i32) {
    %c0_i32 = arith.constant 0 : i32
    %c0_i32_0 = arith.constant 0 : i32
    %c0_i32_1 = arith.constant 0 : i32
    return %c0_i32, %c0_i32_0 : i32, i32
  }
  func.func @transform_5(%arg0: i32, %arg1: i32) -> (i32, i32) {
    %c0_i32 = arith.constant 0 : i32
    %c0_i32_0 = arith.constant 0 : i32
    %c0_i32_1 = arith.constant 0 : i32
    return %c0_i32, %c0_i32_0 : i32, i32
  }
  func.func @transform_6(%arg0: i32, %arg1: i32) -> (i32, i32) {
    %c0_i32 = arith.constant 0 : i32
    %c0_i32_0 = arith.constant 0 : i32
    %c0_i32_1 = arith.constant 0 : i32
    return %c0_i32, %c0_i32_0 : i32, i32
  }
  func.func @transform_7(%arg0: i32, %arg1: i32) -> (i32, i32) {
    %c0_i32 = arith.constant 0 : i32
    %c0_i32_0 = arith.constant 0 : i32
    %c0_i32_1 = arith.constant 0 : i32
    return %c0_i32, %c0_i32_0 : i32, i32
  }
  func.func @transform_8(%arg0: i32, %arg1: i32) -> (i32, i32) {
    %c0_i32 = arith.constant 0 : i32
    %c0_i32_0 = arith.constant 0 : i32
    %c0_i32_1 = arith.constant 0 : i32
    return %c0_i32, %c0_i32_0 : i32, i32
  }
  func.func @transform_9(%arg0: i32, %arg1: i32) -> (i32, i32, i32) {
    %c0_i32 = arith.constant 0 : i32
    %c0_i32_0 = arith.constant 0 : i32
    return %arg0, %arg1, %c0_i32 : i32, i32, i32
  }
}

</mosaic_0001>

<bundles_post_ra>
// kernel: tpu_custom_call.1
= control target key start
LH: loop header
LB: loop body
LE: loop exit
PB: predicated region body
PF: predicated region fallthrough
CT: control target
= control target key end

     0   :  { %s2743_s0 = inlined_call_operand.hbm [shape: f32[2,16,32], index: 0, kind: input, shape index: {}]   ;;  %s2744_s1 = inlined_call_operand.hbm [shape: f32[16,16], index: 1, kind: input, shape index: {}]   ;;  %s2745_s2 = inlined_call_operand.vmem [shape: f32[1,32], index: 2, kind: input, shape index: {}]   ;;  %s2746_s3 = inlined_call_operand.vmem [shape: f32[1,32], index: 3, kind: input, shape index: {}]   ;;  %s2747_s4 = inlined_call_operand.hbm [shape: f32[32,96], index: 4, kind: input, shape index: {}]   ;;  %s2748_s5 = inlined_call_operand.hbm [shape: f32[32,32], index: 5, kind: input, shape index: {}]   ;;  %s2749_s6 = inlined_call_operand.vmem [shape: f32[1,32], index: 6, kind: input, shape index: {}]   ;;  %s2750_s7 = inlined_call_operand.hbm [shape: f32[32,32], index: 7, kind: input, shape index: {}]   ;;  %s2751_s8 = inlined_call_operand.vmem [shape: f32[1,32], index: 8, kind: input, shape index: {}]   ;;  %s2752_s9 = inlined_call_operand.hbm [shape: f32[2,16,32], index: 9, kind: output, shape index: {}]  }
   0x1   :  { %2756 = sst [smem:[#allocation17_spill]] %s2744_s1 }
   0x2   :  { %2757 = sst [smem:[#allocation18_spill]] %s2747_s4 }
   0x3   :  { %2758 = sst [smem:[#allocation19_spill]] %s2748_s5 }
   0x4   :  { %2759 = sst [smem:[#allocation20_spill]] %s2750_s7 }
   0x5   :  { %14 = vsyncpa [#allocation3], 0 }
   0x6   :  { %16 = vsyncpa [#allocation3 + $0x1], 0 }
   0x7   :  { %17 = vsyncpa [#allocation6], 0 }
   0x8   :  { %18 = vsyncpa [#allocation9], 0 }
   0x9   :  { %19 = vsyncpa [#allocation4], 0 }
   0xa   :  { %21 = vsyncpa [#allocation4 + $0x1], 0  ;;  %s2361_s30 = smov 0   ;;  %s2363_s10 = smov 0  }
   0xb   :  { %s2365_s11 = smov 0   ;;  %s2367_s12 = smov 0  }
   0xc   :  { %s2369_s13 = smov 0   ;;  %s2371_s14 = smov 0  }
   0xd LB: > { %s1724_s15 = sadd.s32 4294967295, %s2292_s14   ;;  %s1725_s16 = sadd.s32 4294967294, %s2292_s14   ;;  %s2292_s14 = sphi %s2371_s14, %s27_s14   ;;  %s2288_s13 = sphi %s2369_s13, %s2782_s13   ;;  %s2284_s12 = sphi %s2367_s12, %s2781_s12   ;;  %s2280_s11 = sphi %s2365_s11, %s2780_s11   ;;  %s2276_s10 = sphi %s2363_s10, %s2779_s10   ;;  %s2272_s30 = sphi %s2361_s30, %s2778_s30  }
   0xe   : > { %p61_p0 = scmp.ne.s32.totalorder %s2276_s10, %s2272_s30  ;;  %p2395_p1 = scmp.eq.s32.totalorder %s1724_s15, 0 }
   0xf   : > { %p2399_p2 = scmp.eq.s32.totalorder %s1724_s15, 1  ;;  %p261_p3 = scmp.eq.s32.totalorder %s1725_s16, 1 }
  0x10   : > { %p2405_p4 = por %p2395_p1, %p61_p0  ;;  %p1726_p5 = scmp.ge.s32.totalorder %s2292_s14, 1 }
  0x11   : > { %p2410_p6 = por %p261_p3, %p61_p0  ;;  %p268_p7 = scmp.lt.s32.totalorder %s2292_s14, 3 }
  0x12   : > { %s2294_s22 = smov [#allocation5]   ;;  %s2295_s25 = smov [#allocation8]  }
  0x13   : > { %s2763_s20 = scalar_select %p2410_p6, 1, 0 }
  0x14   : > { %p2415_p8 = pnand %p1726_p5, %p268_p7  ;;  %s280_s23 = sshll.u32 %s2294_s22, 4  ;;  %s281_s23 = int_to_ptr.vmem [resolvable:$true] %s280_s23 }
  0x15   : > { %2764 = sst [smem:[#allocation16_spill]] %s2763_s20  ;;  %s312_s26 = sshll.u32 %s2295_s25, 4  ;;  %s313_s26 = int_to_ptr.vmem [resolvable:$true] %s312_s26 }
  0x16   : > { %p1942_p9 = pneg %p2415_p8  ;;  %s2296_s27 = smov [#allocation7]  }
  0x17   : > { %s299_s28 = sshll.u32 %s2296_s27, 4  ;;  %s2083_s29 = scalar_lea.vmem %s281_s23, 256  ;;  %s300_s28 = int_to_ptr.vmem [resolvable:$true] %s299_s28 }
  0x18   : > { %p2424_p11 = pnand %p1942_p9, %p2395_p1  ;;  %p2084_p13 = scmp.ne.s32.totalorder %s281_s23, %s2083_s29 }
  0x19   : > { %p2091_p5 = scmp.lt.s32.totalorder %s281_s23, %s281_s23  ;;  %p2092_p7 = scmp.lt.s32.totalorder %s2083_s29, %s2083_s29 }
  0x1a   : > { %p2074_p12 = pneg %p2424_p11 }
  0x1b   : > { %p2093_p9 = por %p2092_p7, %p2091_p5 }
  0x1c   : > { %p2086_p0 = pnand %p2084_p13, %p2074_p12 }
  0x1e   : > { %p2087_p3 = pneg %p2086_p0 }
  0x20   : > { %p2094_p10 = pnand %p2093_p9, %p2087_p3 }
  0x22   : > { %2097 = shalt.err (!%p2094_p10)
}
  0x23   : > { %s2754_s15 = smov 128   ;;  %s2755_s16 = smov 8  }
  0x24   : > { %s2767_s1 = sld [smem:[#allocation17_spill]]  ;;  %s2109_s27 = scalar_lea.vmem %s313_s26, 512 }
  0x25   : > { %p2110_p13 = scmp.ne.s32.totalorder %s313_s26, %s2109_s27  ;;  %p2117_p3 = scmp.lt.s32.totalorder %s313_s26, %s313_s26 }
  0x26   : > { %p2118_p10 = scmp.lt.s32.totalorder %s2109_s27, %s2109_s27 }
  0x27   : > { %p2112_p0 = pnand %p2110_p13, %p2074_p12 }
  0x28   : > { %p2119_p7 = por %p2118_p10, %p2117_p3 }
  0x29   : > { %p2113_p5 = pneg %p2112_p0 }
  0x2a   : > { %1945 = dma.hbm_to_vmem [thread:$0]  (!%p2424_p11), %s2767_s1, 256, %s281_s23, [#allocation6], %s2754_s15, %s2754_s15, %s2755_s16  }
  0x2b   : > { %p2120_p9 = pnand %p2119_p7, %p2113_p5 }
  0x2d   : > { %2123 = shalt.err (!%p2120_p9)
}
  0x2e   : > { %s2768_s5 = sld [smem:[#allocation19_spill]]  ;;  %s2135_s23 = scalar_lea.vmem %s300_s28, 512 }
  0x2f   : > { %p2136_p6 = scmp.ne.s32.totalorder %s300_s28, %s2135_s23  ;;  %p2143_p3 = scmp.lt.s32.totalorder %s300_s28, %s300_s28 }
  0x30   : > { %p2144_p5 = scmp.lt.s32.totalorder %s2135_s23, %s2135_s23 }
  0x31   : > { %p2138_p13 = pnand %p2136_p6, %p2074_p12 }
  0x32   : > { %p2145_p10 = por %p2144_p5, %p2143_p3 }
  0x33   : > { %p2139_p0 = pneg %p2138_p13 }
  0x34   : > { %1951 = dma.hbm_to_vmem [thread:$0]  (!%p2424_p11), %s2768_s5, 512, %s313_s26, [#allocation9], %s2754_s15, %s2754_s15, %s2755_s16  }
  0x35   : > { %p2146_p7 = pnand %p2145_p10, %p2139_p0 }
  0x37   : > { %2149 = shalt.err (!%p2146_p7)
}
  0x38   : > { %s2769_s4 = sld [smem:[#allocation18_spill]]  ;;  %s2299_s26 = smov [#allocation10]  }
  0x39   : > { %s328_s25 = sshll.u32 %s2299_s26, 4  ;;  %s329_s25 = int_to_ptr.vmem [resolvable:$true] %s328_s25 }
  0x3a   : > { %s2161_s27 = scalar_lea.vmem %s329_s25, 512  ;;  %p2169_p0 = scmp.lt.s32.totalorder %s329_s25, %s329_s25 }
  0x3b   : > { %p2162_p6 = scmp.ne.s32.totalorder %s329_s25, %s2161_s27  ;;  %p2170_p3 = scmp.lt.s32.totalorder %s2161_s27, %s2161_s27 }
  0x3d   : > { %p2164_p9 = pnand %p2162_p6, %p2074_p12  ;;  %p2171_p5 = por %p2170_p3, %p2169_p0 }
  0x3e   : > { %1948 = dma.hbm_to_vmem [thread:$0]  (!%p2424_p11), %s2769_s4, 512, %s300_s28, [#allocation6], %s2754_s15, %s2754_s15, %s2755_s16  }
  0x3f   : > { %p2165_p13 = pneg %p2164_p9 }
  0x41   : > { %p2172_p10 = pnand %p2171_p5, %p2165_p13 }
  0x43   : > { %2175 = shalt.err (!%p2172_p10)
}
  0x44   : > { %s2770_s7 = sld [smem:[#allocation20_spill]]  ;;  %s39_s23 = sadd.s32 1, %s2288_s13 }
  0x45   : > { %s48_s24 = sadd.s32 1, %s2280_s11  ;;  %p41_p12 = scmp.ge.s32.totalorder %s39_s23, 2 }
  0x46   : > { %p55_p7 = scmp.ne.s32.totalorder %s2280_s11, %s2276_s10  ;;  %p56_p6 = scmp.eq.s32.totalorder %s2292_s14, 0 }
  0x47   : > { %p1967_p9 = scmp.lt.s32.totalorder %s2292_s14, 2  ;;  %s2784_s23 = smov (%p41_p12, %s39_s23), 0 }
  0x48   : > { %p57_p13 = por %p56_p6, %p55_p7  ;;  %p2484_p0 = por %p2399_p2, %p55_p7 }
  0x49   : > { %s43_s22 = ssub.s32 %s2288_s13, %s2784_s23  ;;  %s345_s26 = sand.u32 1, %s2280_s11  }
  0x4a   : > { %1954 = dma.hbm_to_vmem [thread:$0]  (!%p2424_p11), %s2770_s7, 512, %s329_s25, [#allocation9], %s2754_s15, %s2754_s15, %s2755_s16  }
  0x4b   : > { %p46_p3 = scmp.eq.s32.totalorder %s43_s22, 0  ;;  %s1732_s25 = sshll.u32 %s345_s26, 4 }
  0x4c   : > { %s1781_s27 = sshll.u32 %s2288_s13, 8  ;;  %s349_s1 = scalar_lea.vmem [#allocation2], %s1732_s25 }
  0x4d   : > { %s2493_s28 = scalar_select %p46_p3, %s2280_s11, %s48_s24  }
  0x4e   : > { %s357_s16 = scalar_lea.hbm %s2743_s0, %s1781_s27  ;;  %s358_s4 = sshll.u32 %s349_s1, 4  ;;  %s359_s4 = int_to_ptr.vmem [resolvable:$true] %s358_s4 }
  0x4f   : > { %p2500_p11 = pnand %p1967_p9, %p57_p13  ;;  %s346_s5 = scalar_lea.sflag [#allocation3], %s345_s26 }
  0x50   : > { %s2189_s22 = scalar_lea.vmem %s359_s4, 256  ;;  %s2300_s24 = smov [#allocation2]  }
  0x51   : > { %p2178_p2 = pneg %p2500_p11  ;;  %p2190_p5 = scmp.ne.s32.totalorder %s359_s4, %s2189_s22 }
  0x52   : > { %s2194_s7 = sshll.u32 %s2300_s24, 4  ;;  %s2195_s7 = int_to_ptr.vmem [resolvable:$false] %s2194_s7 }
  0x53   : > { %p2192_p10 = pnand %p2190_p5, %p2178_p2  ;;  %s2196_s15 = scalar_lea.vmem %s2195_s7, 512 }
  0x54   : > { %p2197_p7 = scmp.lt.s32.totalorder %s359_s4, %s2195_s7  ;;  %p2198_p6 = scmp.lt.s32.totalorder %s2196_s15, %s2189_s22 }
  0x55   : > { %p2193_p12 = pneg %p2192_p10 }
  0x56   : > { %p2199_p3 = por %p2198_p6, %p2197_p7 }
  0x58   : > { %p2200_p9 = pnand %p2199_p3, %p2193_p12 }
  0x5a   : > { %2203 = shalt.err (!%p2200_p9)
}
  0x5b   : > { %s2773_s1 = smov 8   ;;  %s2774_s25 = smov 128  }
  0x5c   : > { %1958 = dma.hbm_to_vmem [thread:$0]  (!%p2500_p11), %s357_s16, 256, %s359_s4, %s346_s5, %s2774_s25, %s2774_s25, %s2773_s1  }
  0x5d   : > { %370 = sbr.rel (%p2415_p8) target bundleno = 2092 (0x82c), region = 56  ;;  %s2514_s26 = sand.u32 (!%p2415_p8), 1, %s2276_s10  }
  0x5e   : > { %s1736_s7 = sshll.u32 (!%p2415_p8), %s2514_s26, 4  ;;  %s373_s27 = scalar_lea.sflag (!%p2415_p8), [#allocation3], %s2514_s26 }
  0x5f   : > { %s376_s29 = scalar_lea.vmem (!%p2415_p8), [#allocation2], %s1736_s7 }
  0x62   : > { %2255 = dma.done.wait (%p2405_p4), %s373_s27, 256  }
  0x63   : > { %2257 = vsyncadd (%p2405_p4), %s373_s27, 4294967040 }
  0x64   : > { %2259 = dma.done.wait (%p2395_p1), [#allocation6], 768  }
  0x65   : > { %2261 = vsyncadd (%p2395_p1), [#allocation6], 4294966528 }
  0x66   : > { %2263 = dma.done.wait (%p2395_p1), [#allocation9], 1024  }
  0x67   : > { %2265 = vsyncadd (%p2395_p1), [#allocation9], 4294966272  ;;  %vm433_vm0 = vcmask 261120   ;;  %v2532_v0 = vld [vmem:[%s376_s29] sm:$0xff]  ;;  %v2534_v1 = vld [vmem:[%s376_s29 + $0x8] sm:$0xff]  ;;  %vm582_vm1 = vcmask 64512  }
  0x68   : > { %v434_v2 = vsel %vm433_vm0, %v2532_v0, 0.0  ;;  %v437_v3 = vsel %vm433_vm0, %v2534_v1, 0.0  ;;  %v480_v14 = vld [vmem:[#allocation7 + $0x18] sm:$0xff]  ;;  %v479_v15 = vld [vmem:[#allocation7 + $0x10] sm:$0xff]  ;;  %v478_v16 = vld [vmem:[#allocation7 + $0x8] sm:$0xff]  ;;  %s2301_s21 = smov 112  }
  0x69   : > { %435 = vadd.xlane.f32.xlu0 %v434_v2  ;;  %1833 = vmatprep.subr.mxu0 %v480_v14  ;;  %v477_v17 = vld [vmem:[#allocation7] sm:$0xff]  ;;  %v1742_v25 = vld [vmem:[%s2745_s2] ss:$0 sm:$0xff]  ;;  %s2302_s16 = smov 120   ;;  %s2303_s18 = smov 96   ;;  %v482_v50 = vld [vmem:[#allocation5 + $0x8] sm:$0xff] }
  0x6a   : > { %1834 = vmatpush3.msra.mxu0 %v480_v14  ;;  %v1743_v27 = vld [vmem:[%s2746_s3] ss:$0 sm:$0xff]  ;;  %s2304_s22 = smov 104   ;;  %vm927_vm2 = vcmask 130048   ;;  %s2305_s24 = smov 64   ;;  %vm1392_vm3 = vcmask 195584  }
  0x6b   : > { %1835 = vmatprep.subr.mxu0 %v479_v15  ;;  %v481_v52 = vld [vmem:[#allocation5] sm:$0xff]  ;;  %s2306_s15 = smov 8   ;;  %s2307_s1 = smov 16  }
  0x6c   : > { %1836 = vmatpush3.msra.mxu0 %v479_v15  ;;  %s2308_s25 = smov 24   ;;  %s1782_s17 = sshll.u32 %s2284_s12, 8 }
  0x6d   : > { %438 = vadd.xlane.f32.xlu0 %v437_v3  ;;  %1837 = vmatprep.subr.mxu0 %v478_v16  ;;  %s426_s19 = scalar_lea.vmem [#allocation11], %s1736_s7  ;;  %s1584_s12 = scalar_lea.sflag [#allocation4], %s2514_s26 }
  0x6e   : > { %1838 = vmatpush3.msra.mxu0 %v478_v16 }
  0x6f   : > { %1839 = vmatprep.subr.mxu0 %v477_v17 }
  0x70   : > { %1840 = vmatpush3.msra.mxu0 %v477_v17 }
  0xf2   : > { %v436_v4 = vpop.xlane.xlu0 %435 }
  0xf3   : > { %v441_v5 = vmul.f32 0.03125, %v436_v4 }
  0xf5   : > { %v443_v6 = vsub.f32 %v2532_v0, %v441_v5 }
  0xf6   : > { %v439_v7 = vpop.xlane.xlu0 %438 }
  0xf7   : > { %v442_v8 = vmul.f32 0.03125, %v439_v7  ;;  %v445_v9 = vmul.f32 %v443_v6, %v443_v6 }
  0xf9   : > { %v444_v10 = vsub.f32 %v2534_v1, %v442_v8  ;;  %v447_v11 = vsel %vm433_vm0, %v445_v9, 0.0 }
  0xfa   : > { %448 = vadd.xlane.f32.xlu1 %v447_v11 }
  0xfb   : > { %v446_v12 = vmul.f32 %v444_v10, %v444_v10 }
  0xfd   : > { %v450_v13 = vsel %vm433_vm0, %v446_v12, 0.0 }
  0xfe   : > { %451 = vadd.xlane.f32.xlu1 %v450_v13 }
 0x183   : > { %v449_v18 = vpop.xlane.xlu1 %448 }
 0x184   : > { %v453_v19 = vmul.f32 0.03125, %v449_v18 }
 0x186   : > { %v455_v20 = vadd.f32 1e-05, %v453_v19 }
 0x187   : > { %v452_v21 = vpop.xlane.xlu1 %451 }
 0x188   : > { %2036 = vrsqrt.f32 %v455_v20  ;;  %v454_v22 = vmul.f32 0.03125, %v452_v21 }
 0x18a   : > { %v456_v23 = vadd.f32 1e-05, %v454_v22 }
 0x18c   : > { %2038 = vrsqrt.f32 %v456_v23 }
 0x195   : > { %v2037_v24 = vpop.eup %2036 }
 0x196   : > { %v459_v26 = vmul.f32 %v2037_v24, %v443_v6 }
 0x198   : > { %v467_v28 = vmul.f32 %v1742_v25, %v459_v26 }
 0x199   : > { %v2039_v29 = vpop.eup %2038 }
 0x19a   : > { %v460_v30 = vmul.f32 %v2039_v29, %v444_v10  ;;  %v475_v31 = vadd.f32 %v1743_v27, %v467_v28 }
 0x19c   : > { %v468_v32 = vmul.f32 %v1742_v25, %v460_v30  ;;  %1841 = vmatprep.mubr.msk.f32.mxu0 %vm433_vm0, %v475_v31 }
 0x19e   : > { %v476_v33 = vadd.f32 %v1743_v27, %v468_v32 }
 0x1a0   : > { %1842 = vmatmul.mubr.msk.f32.vlgmr.msra.gmra.mxu0 %vm433_vm0, %v476_v33 }
 0x260   : > { %v2552_v34 = vpop.f32.mrf.mxu0 }
 0x261   : > { %572 = vrot.lane.b32.xlu1 %v2552_v34, %s2301_s21  ;;  %568 = vrot.lane.b32.xlu0 %v2552_v34, %s2302_s16 }
 0x262   : > { %v2556_v35 = vpop.f32.mrf.mxu0 }
 0x263   : > { %1848 = vmatprep.mubr.msk.f32.mxu1 %vm582_vm1, %v2556_v35 }
 0x265   : > { %570 = vrot.lane.b32.xlu0 %v2556_v35, %s2301_s21  ;;  %566 = vrot.lane.b32.xlu1 %v2556_v35, %s2302_s16  ;;  %s1599_s21 = sshll.u32 %s426_s19, 4  ;;  %s2693_s21 = int_to_ptr.vmem [resolvable:$true] %s1599_s21 }
 0x266   : > { %s2204_s7 = scalar_lea.vmem %s2693_s21, 256 }
 0x267   : > { %p2205_p1 = scmp.ne.s32.totalorder %s2693_s21, %s2204_s7 }
 0x269   : > { %580 = vrot.lane.b32.xlu0 %v2552_v34, %s2303_s18  ;;  %576 = vrot.lane.b32.xlu1 %v2552_v34, %s2304_s22  ;;  %p2206_p4 = pnand %p2205_p1, %p2484_p0 }
 0x26b   : > { %p2207_p8 = pneg %p2206_p4 }
 0x26d   : > { %578 = vrot.lane.b32.xlu0 %v2556_v35, %s2303_s18  ;;  %574 = vrot.lane.b32.xlu1 %v2556_v35, %s2304_s22  ;;  %s2689_s22 = scalar_lea.hbm %s2752_s9, %s1782_s17 }
 0x2d3   : > { %v2566_v36 = vpop.permute.xlu1 %572  ;;  %v2568_v37 = vpop.permute.xlu0 %568 }
 0x2d4   : > { %755 = vrot.lane.b32.xlu0 %v2566_v36, %s2303_s18  ;;  %668 = vrot.lane.b32.xlu1 %v2568_v37, %s2303_s18 }
 0x2d7   : > { %v2572_v38 = vpop.permute.xlu0 %570  ;;  %v2574_v39 = vpop.permute.xlu1 %566 }
 0x2d8   : > { %753 = vrot.lane.b32.xlu0 %v2572_v38, %s2303_s18  ;;  %1855 = vmatprep.mubr.msk.f32.mxu0 %vm582_vm1, %v2574_v39 }
 0x2d9   : > { %666 = vrot.lane.b32.xlu1 %v2574_v39, %s2303_s18 }
 0x2db   : > { %v581_v40 = vpop.permute.xlu0 %580  ;;  %v2580_v41 = vpop.permute.xlu1 %576 }
 0x2dc   : > { %1844 = vmatprep.subr.msk.mxu1 %vm582_vm1, %v581_v40 }
 0x2dd   : > { %842 = vrot.lane.b32.xlu1 %v2580_v41, %s2303_s18  ;;  %1845 = vmatpush3.xpose.msk.msra.mxu1 %vm582_vm1, %v581_v40 }
 0x2df   : > { %v579_v42 = vpop.permute.xlu0 %578  ;;  %v2585_v43 = vpop.permute.xlu1 %574 }
 0x2e0   : > { %1846 = vmatprep.subr.msk.mxu1 %vm582_vm1, %v579_v42 }
 0x2e1   : > { %840 = vrot.lane.b32.xlu1 %v2585_v43, %s2303_s18  ;;  %1847 = vmatpush3.xpose.msk.msra.mxu1 %vm582_vm1, %v579_v42 }
 0x2e4   : > { %1849 = vmatmul.mubr.msk.f32.vlgmr.msra.gmra.mxu1 %vm582_vm1, %v2552_v34 }
 0x2e5   : > { %1862 = vmatprep.mubr.msk.f32.mxu1 %vm582_vm1, %v2572_v38 }
 0x346   : > { %v756_v44 = vpop.permute.xlu0 %755  ;;  %v669_v45 = vpop.permute.xlu1 %668 }
 0x347   : > { %1851 = vmatprep.subr.msk.mxu0 %vm582_vm1, %v669_v45  ;;  %1858 = vmatprep.subr.msk.mxu1 %vm582_vm1, %v756_v44 }
 0x348   : > { %1852 = vmatpush3.xpose.msk.msra.mxu0 %vm582_vm1, %v669_v45  ;;  %1859 = vmatpush3.xpose.msk.msra.mxu1 %vm582_vm1, %v756_v44 }
 0x34a   : > { %v754_v46 = vpop.permute.xlu0 %753 }
 0x34b   : > { %v667_v47 = vpop.permute.xlu1 %666  ;;  %1860 = vmatprep.subr.msk.mxu1 %vm582_vm1, %v754_v46 }
 0x34c   : > { %1853 = vmatprep.subr.msk.mxu0 %vm582_vm1, %v667_v47  ;;  %1861 = vmatpush3.xpose.msk.msra.mxu1 %vm582_vm1, %v754_v46 }
 0x34d   : > { %1854 = vmatpush3.xpose.msk.msra.mxu0 %vm582_vm1, %v667_v47 }
 0x34f   : > { %v843_v48 = vpop.permute.xlu1 %842  ;;  %1863 = vmatmul.mubr.msk.f32.vlgmr.msra.gmra.mxu1 %vm582_vm1, %v2566_v36 }
 0x350   : > { %1856 = vmatmul.mubr.msk.f32.vlgmr.msra.gmra.mxu0 %vm582_vm1, %v2568_v37  ;;  %1865 = vmatprep.subr.msk.mxu0 %vm582_vm1, %v843_v48 }
 0x351   : > { %1866 = vmatpush3.xpose.msk.msra.mxu0 %vm582_vm1, %v843_v48  ;;  %1869 = vmatprep.mubr.msk.f32.mxu0 %vm582_vm1, %v2585_v43 }
 0x353   : > { %v841_v49 = vpop.permute.xlu1 %840 }
 0x354   : > { %1867 = vmatprep.subr.msk.mxu0 %vm582_vm1, %v841_v49 }
 0x355   : > { %1868 = vmatpush3.xpose.msk.msra.mxu0 %vm582_vm1, %v841_v49 }
 0x358   : > { %1870 = vmatmul.mubr.msk.f32.vlgmr.msra.gmra.mxu0 %vm582_vm1, %v2580_v41 }
 0x3a4   : > { %v1850_v51 = vpop.f32.mrf.mxu1 }
 0x3a5   : > { %v663_v53 = vadd.f32 %v1850_v51, %v482_v50 }
 0x3a6   : > { %v657_v54 = vpop.f32.mrf.mxu1 }
 0x3a7   : > { %v658_v55 = vadd.f32 %v657_v54, %v481_v52  ;;  %v931_v56 = vsel %vm927_vm2, %v663_v53, -inf }
 0x3a8   : > { %932 = vmax.xlane.f32.xlu1 %v931_v56 }
 0x3a9   : > { %v928_v57 = vsel %vm927_vm2, %v658_v55, -inf }
 0x3aa   : > { %929 = vmax.xlane.f32.xlu0 %v928_v57 }
 0x40f   : > { %v1864_v58 = vpop.f32.mrf.mxu1 }
 0x410   : > { %v1857_v59 = vpop.f32.mrf.mxu0  ;;  %v837_v60 = vadd.f32 %v1864_v58, %v482_v50 }
 0x411   : > { %v750_v61 = vadd.f32 %v1857_v59, %v482_v50  ;;  %v831_v4 = vpop.f32.mrf.mxu1 }
 0x412   : > { %v744_v62 = vpop.f32.mrf.mxu0  ;;  %v943_v63 = vsel %vm927_vm2, %v837_v60, -inf  ;;  %v832_v5 = vadd.f32 %v831_v4, %v481_v52 }
 0x413   : > { %v745_v2 = vadd.f32 %v744_v62, %v481_v52  ;;  %944 = vmax.xlane.f32.xlu1 %v943_v63  ;;  %v937_v3 = vsel %vm927_vm2, %v750_v61, -inf }
 0x414   : > { %938 = vmax.xlane.f32.xlu0 %v937_v3  ;;  %v940_v12 = vsel %vm927_vm2, %v832_v5, -inf }
 0x415   : > { %v934_v6 = vsel %vm927_vm2, %v745_v2, -inf }
 0x418   : > { %v1871_v7 = vpop.f32.mrf.mxu0  ;;  %935 = vmax.xlane.f32.xlu0 %v934_v6 }
 0x419   : > { %v924_v8 = vadd.f32 %v1871_v7, %v482_v50 }
 0x41a   : > { %v918_v9 = vpop.f32.mrf.mxu0 }
 0x41b   : > { %v919_v10 = vadd.f32 %v918_v9, %v481_v52  ;;  %v949_v11 = vsel %vm927_vm2, %v924_v8, -inf }
 0x41c   : > { %950 = vmax.xlane.f32.xlu1 %v949_v11  ;;  %941 = vmax.xlane.f32.xlu0 %v940_v12 }
 0x41d   : > { %v946_v13 = vsel %vm927_vm2, %v919_v10, -inf }
 0x420   : > { %947 = vmax.xlane.f32.xlu0 %v946_v13 }
 0x42d   : > { %1016 = vrot.lane.b32.xlu1 %v2556_v35, %s2305_s24 }
 0x431   : > { %1105 = vrot.lane.b32.xlu1 %v2568_v37, %s2305_s24  ;;  %v933_v16 = vpop.xlane.xlu1 %932 }
 0x432   : > { %v953_v17 = vsub.f32 %v663_v53, %v933_v16 }
 0x433   : > { %v930_v14 = vpop.xlane.xlu0 %929 }
 0x434   : > { %v952_v15 = vsub.f32 %v658_v55, %v930_v14  ;;  %v962_v19 = vmul.f32 1.442695, %v953_v17 }
 0x435   : > { %1103 = vrot.lane.b32.xlu1 %v2574_v39, %s2305_s24 }
 0x436   : > { %1018 = vrot.lane.b32.xlu0 %v2552_v34, %s2305_s24  ;;  %v960_v18 = vmul.f32 1.442695, %v952_v15 }
 0x438   : > { %2040 = vpow2.f32 %v960_v18 }
 0x439   : > { %1279 = vrot.lane.b32.xlu1 %v2580_v41, %s2305_s24  ;;  %2042 = vpow2.f32 %v962_v19 }
 0x43a   : > { %1192 = vrot.lane.b32.xlu0 %v2566_v36, %s2305_s24 }
 0x445   : > { %v2634_v20 = vpop.eup %2040 }
 0x446   : > { %v976_v21 = vsel %vm927_vm2, %v2634_v20, 0.0  ;;  %v2638_v22 = vpop.eup %2042 }
 0x447   : > { %v979_v23 = vsel %vm927_vm2, %v2638_v22, 0.0 }
 0x459   : > { %977 = vadd.xlane.f32.xlu0 %v976_v21 }
 0x45d   : > { %980 = vadd.xlane.f32.xlu1 %v979_v23 }
 0x49c   : > { %v945_v24 = vpop.xlane.xlu1 %944 }
 0x49d   : > { %v957_v25 = vsub.f32 %v837_v60, %v945_v24  ;;  %v939_v26 = vpop.xlane.xlu0 %938  ;;  %v1398_v24 = vld [vmem:[#allocation8 + $0x18] sm:$0xff] }
 0x49e   : > { %v955_v27 = vsub.f32 %v750_v61, %v939_v26  ;;  %v1397_v26 = vld [vmem:[#allocation8 + $0x10] sm:$0xff] }
 0x49f   : > { %v970_v28 = vmul.f32 1.442695, %v957_v25 }
 0x4a0   : > { %v966_v29 = vmul.f32 1.442695, %v955_v27  ;;  %v1396_v27 = vld [vmem:[#allocation8 + $0x8] sm:$0xff] }
 0x4a1   : > { %v936_v30 = vpop.xlane.xlu0 %935 }
 0x4a2   : > { %2044 = vpow2.f32 %v966_v29  ;;  %v954_v31 = vsub.f32 %v745_v2, %v936_v30  ;;  %v1395_v29 = vld [vmem:[#allocation8] sm:$0xff] }
 0x4a3   : > { %2046 = vpow2.f32 %v970_v28 }
 0x4a4   : > { %v964_v32 = vmul.f32 1.442695, %v954_v31  ;;  %v1490_v31 = vld [vmem:[#allocation10 + $0x18] sm:$0xff] }
 0x4a5   : > { %v951_v33 = vpop.xlane.xlu1 %950  ;;  %v942_v34 = vpop.xlane.xlu0 %941 }
 0x4a6   : > { %2048 = vpow2.f32 %v964_v32  ;;  %v959_v35 = vsub.f32 %v924_v8, %v951_v33  ;;  %v956_v36 = vsub.f32 %v832_v5, %v942_v34 }
 0x4a8   : > { %v974_v37 = vmul.f32 1.442695, %v959_v35  ;;  %v968_v39 = vmul.f32 1.442695, %v956_v36 }
 0x4a9   : > { %v948_v40 = vpop.xlane.xlu0 %947  ;;  %v1017_v42 = vpop.permute.xlu1 %1016 }
 0x4aa   : > { %2050 = vpow2.f32 %v974_v37  ;;  %v958_v41 = vsub.f32 %v919_v10, %v948_v40 }
 0x4ab   : > { %2052 = vpow2.f32 %v968_v39 }
 0x4ac   : > { %v972_v44 = vmul.f32 1.442695, %v958_v41 }
 0x4ad   : > { %v1019_v45 = vpop.permute.xlu0 %1018  ;;  %v1106_v49 = vpop.permute.xlu1 %1105 }
 0x4ae   : > { %2054 = vpow2.f32 %v972_v44  ;;  %1872 = vmatprep.subr.mxu1 %v1019_v45 }
 0x4af   : > { %v2045_v46 = vpop.eup %2044  ;;  %1873 = vmatpush3.msra.mxu1 %v1019_v45 }
 0x4b0   : > { %1874 = vmatprep.subr.mxu1 %v1017_v42  ;;  %v985_v47 = vsel %vm927_vm2, %v2045_v46, 0.0  ;;  %v2643_v48 = vpop.eup %2046 }
 0x4b1   : > { %986 = vadd.xlane.f32.xlu1 %v985_v47  ;;  %1875 = vmatpush3.msra.mxu1 %v1017_v42  ;;  %v1193_v50 = vpop.permute.xlu0 %1192  ;;  %v991_v52 = vsel %vm927_vm2, %v2643_v48, 0.0  ;;  %v1104_v60 = vpop.permute.xlu1 %1103 }
 0x4b2   : > { %1879 = vmatprep.subr.mxu1 %v1106_v49  ;;  %1886 = vmatprep.subr.mxu0 %v1193_v50 }
 0x4b3   : > { %v2049_v51 = vpop.eup %2048  ;;  %1887 = vmatpush3.msra.mxu0 %v1193_v50 }
 0x4b4   : > { %v982_v53 = vsel %vm927_vm2, %v2049_v51, 0.0 }
 0x4b5   : > { %992 = vadd.xlane.f32.xlu1 %v991_v52  ;;  %983 = vadd.xlane.f32.xlu0 %v982_v53  ;;  %v1280_v61 = vpop.permute.xlu1 %1279  ;;  %v1488_v52 = vld [vmem:[#allocation10 + $0x8] sm:$0xff]  ;;  %v1487_v53 = vld [vmem:[#allocation10] sm:$0xff] }
 0x4b7   : > { %v2051_v54 = vpop.eup %2050 }
 0x4b8   : > { %v2053_v55 = vpop.eup %2052  ;;  %v997_v56 = vsel %vm927_vm2, %v2051_v54, 0.0 }
 0x4b9   : > { %998 = vadd.xlane.f32.xlu1 %v997_v56  ;;  %v988_v57 = vsel %vm927_vm2, %v2053_v55, 0.0 }
 0x4ba   : > { %989 = vadd.xlane.f32.xlu0 %v988_v57 }
 0x4bb   : > { %v2055_v58 = vpop.eup %2054 }
 0x4bc   : > { %v994_v59 = vsel %vm927_vm2, %v2055_v58, 0.0 }
 0x4be   : > { %995 = vadd.xlane.f32.xlu0 %v994_v59  ;;  %v1773_v59 = vld [vmem:[%s2751_s8] ss:$0 sm:$0xff] }
 0x4ca   : > { %1277 = vrot.lane.b32.xlu1 %v2585_v43, %s2305_s24 }
 0x4d4   : > { %1190 = vrot.lane.b32.xlu0 %v2572_v38, %s2305_s24  ;;  %s2309_s24 = smov [#allocation11]  }
 0x4e2   : > { %v978_v62 = vpop.xlane.xlu0 %977 }
 0x4e3   : > { %2056 = vrcp.f32 %v978_v62 }
 0x4e6   : > { %v981_v63 = vpop.xlane.xlu1 %980 }
 0x4e7   : > { %2058 = vrcp.f32 %v981_v63 }
 0x4f0   : > { %v2057_v2 = vpop.eup %2056 }
 0x4f1   : > { %v1008_v3 = vmul.f32 %v2057_v2, %v2634_v20 }
 0x4f3   : > { %1876 = vmatprep.mubr.msk.f32.mxu1 %vm927_vm2, %v1008_v3 }
 0x4f4   : > { %v2059_v4 = vpop.eup %2058 }
 0x4f5   : > { %v1009_v5 = vmul.f32 %v2059_v4, %v2638_v22 }
 0x4f7   : > { %1877 = vmatmul.mubr.msk.f32.vlgmr.msra.gmra.mxu1 %vm927_vm2, %v1009_v5 }
 0x4f8   : > { %1880 = vmatpush3.msra.mxu1 %v1106_v49 }
 0x4f9   : > { %1881 = vmatprep.subr.mxu1 %v1104_v60 }
 0x4fa   : > { %1882 = vmatpush3.msra.mxu1 %v1104_v60 }
 0x4fb   : > { %1893 = vmatprep.subr.mxu1 %v1280_v61 }
 0x53a   : > { %v987_v38 = vpop.xlane.xlu1 %986 }
 0x53b   : > { %2060 = vrcp.f32 %v987_v38 }
 0x53e   : > { %v993_v43 = vpop.xlane.xlu1 %992  ;;  %v984_v6 = vpop.xlane.xlu0 %983 }
 0x53f   : > { %2062 = vrcp.f32 %v984_v6 }
 0x540   : > { %2064 = vrcp.f32 %v993_v43 }
 0x542   : > { %v999_v8 = vpop.xlane.xlu1 %998 }
 0x543   : > { %v990_v7 = vpop.xlane.xlu0 %989 }
 0x544   : > { %2066 = vrcp.f32 %v990_v7 }
 0x545   : > { %2068 = vrcp.f32 %v999_v8 }
 0x546   : > { %v1278_v17 = vpop.permute.xlu1 %1277 }
 0x547   : > { %v996_v9 = vpop.xlane.xlu0 %995 }
 0x548   : > { %2070 = vrcp.f32 %v996_v9  ;;  %v2061_v11 = vpop.eup %2060 }
 0x549   : > { %v1011_v14 = vmul.f32 %v2061_v11, %v2045_v46 }
 0x54b   : > { %v1191_v10 = vpop.permute.xlu0 %1190 }
 0x54c   : > { %1888 = vmatprep.subr.mxu0 %v1191_v10  ;;  %v2063_v12 = vpop.eup %2062 }
 0x54d   : > { %1889 = vmatpush3.msra.mxu0 %v1191_v10  ;;  %v1010_v13 = vmul.f32 %v2063_v12, %v2049_v51  ;;  %v2065_v15 = vpop.eup %2064  ;;  %v1489_v51 = vld [vmem:[#allocation10 + $0x10] sm:$0xff] }
 0x54e   : > { %v1013_v19 = vmul.f32 %v2065_v15, %v2643_v48  ;;  %1900 = vmatprep.subr.mxu0 %v1398_v24 }
 0x54f   : > { %1883 = vmatprep.mubr.msk.f32.mxu1 %vm927_vm2, %v1010_v13 }
 0x550   : > { %1884 = vmatmul.mubr.msk.f32.vlgmr.msra.gmra.mxu1 %vm927_vm2, %v1011_v14 }
 0x551   : > { %v2067_v16 = vpop.eup %2066  ;;  %1894 = vmatpush3.msra.mxu1 %v1280_v61 }
 0x552   : > { %v1012_v18 = vmul.f32 %v2067_v16, %v2053_v55  ;;  %1895 = vmatprep.subr.mxu1 %v1278_v17  ;;  %v2069_v20 = vpop.eup %2068  ;;  %v1770_v55 = vld [vmem:[%s2749_s6] ss:$0 sm:$0xff] }
 0x553   : > { %1896 = vmatpush3.msra.mxu1 %v1278_v17  ;;  %v1015_v23 = vmul.f32 %v2069_v20, %v2051_v54 }
 0x554   : > { %1890 = vmatprep.mubr.msk.f32.mxu0 %vm927_vm2, %v1012_v18  ;;  %1911 = vmatprep.subr.mxu1 %v1490_v31 }
 0x555   : > { %v2071_v21 = vpop.eup %2070  ;;  %1891 = vmatmul.mubr.msk.f32.vlgmr.msra.gmra.mxu0 %vm927_vm2, %v1013_v19 }
 0x556   : > { %v1014_v22 = vmul.f32 %v2071_v21, %v2055_v58  ;;  %1901 = vmatpush3.msra.mxu0 %v1398_v24 }
 0x557   : > { %1902 = vmatprep.subr.mxu0 %v1397_v26 }
 0x558   : > { %1897 = vmatprep.mubr.msk.f32.mxu1 %vm927_vm2, %v1014_v22  ;;  %1903 = vmatpush3.msra.mxu0 %v1397_v26 }
 0x559   : > { %1898 = vmatmul.mubr.msk.f32.vlgmr.msra.gmra.mxu1 %vm927_vm2, %v1015_v23  ;;  %1904 = vmatprep.subr.mxu0 %v1396_v27 }
 0x55a   : > { %1905 = vmatpush3.msra.mxu0 %v1396_v27  ;;  %1912 = vmatpush3.msra.mxu1 %v1490_v31 }
 0x55b   : > { %1906 = vmatprep.subr.mxu0 %v1395_v29  ;;  %1913 = vmatprep.subr.mxu1 %v1489_v51 }
 0x55c   : > { %1907 = vmatpush3.msra.mxu0 %v1395_v29  ;;  %1914 = vmatpush3.msra.mxu1 %v1489_v51 }
 0x55d   : > { %1915 = vmatprep.subr.mxu1 %v1488_v52 }
 0x55e   : > { %1916 = vmatpush3.msra.mxu1 %v1488_v52 }
 0x55f   : > { %1917 = vmatprep.subr.mxu1 %v1487_v53 }
 0x560   : > { %1918 = vmatpush3.msra.mxu1 %v1487_v53 }
 0x5b7   : > { %v1878_v25 = vpop.f32.mrf.mxu1 }
 0x5b9   : > { %v1094_v28 = vpop.f32.mrf.mxu1 }
 0x610   : > { %v1885_v30 = vpop.f32.mrf.mxu1 }
 0x611   : > { %1368 = vrot.lane.b32.xlu1 %v1885_v30, %s2306_s15 }
 0x612   : > { %v1181_v32 = vpop.f32.mrf.mxu1 }
 0x613   : > { %1366 = vrot.lane.b32.xlu0 %v1181_v32, %s2306_s15 }
 0x615   : > { %v1892_v33 = vpop.f32.mrf.mxu0 }
 0x616   : > { %1376 = vrot.lane.b32.xlu1 %v1892_v33, %s2307_s1 }
 0x617   : > { %v1268_v34 = vpop.f32.mrf.mxu0 }
 0x618   : > { %1374 = vrot.lane.b32.xlu0 %v1268_v34, %s2307_s1  ;;  %s2208_s1 = sshll.u32 %s2309_s24, 4  ;;  %s2209_s1 = int_to_ptr.vmem [resolvable:$false] %s2208_s1 }
 0x619   : > { %v1899_v35 = vpop.f32.mrf.mxu1  ;;  %p2211_p13 = scmp.lt.s32.totalorder %s2693_s21, %s2209_s1 }
 0x61a   : > { %1384 = vrot.lane.b32.xlu1 %v1899_v35, %s2308_s25 }
 0x61b   : > { %v1355_v36 = vpop.f32.mrf.mxu1 }
 0x61c   : > { %1382 = vrot.lane.b32.xlu0 %v1355_v36, %s2308_s25  ;;  %s2210_s25 = scalar_lea.vmem %s2209_s1, 512 }
 0x61d   : > { %p2212_p11 = scmp.lt.s32.totalorder %s2210_s25, %s2204_s7 }
 0x61f   : > { %p2213_p2 = por %p2212_p11, %p2211_p13 }
 0x621   : > { %p2214_p5 = pnand %p2213_p2, %p2207_p8 }
 0x683   : > { %v1369_v37 = vpop.permute.xlu1 %1368 }
 0x684   : > { %v1389_v45 = vsel %vm582_vm1, %v1878_v25, %v1369_v37 }
 0x685   : > { %v1367_v39 = vpop.permute.xlu0 %1366 }
 0x686   : > { %v1388_v42 = vsel %vm582_vm1, %v1094_v28, %v1367_v39 }
 0x688   : > { %v1377_v40 = vpop.permute.xlu1 %1376 }
 0x689   : > { %v1391_v48 = vsel %vm927_vm2, %v1389_v45, %v1377_v40 }
 0x68a   : > { %v1375_v41 = vpop.permute.xlu0 %1374 }
 0x68b   : > { %v1390_v46 = vsel %vm927_vm2, %v1388_v42, %v1375_v41 }
 0x68c   : > { %v1385_v44 = vpop.permute.xlu1 %1384 }
 0x68d   : > { %v1394_v50 = vsel %vm1392_vm3, %v1391_v48, %v1385_v44 }
 0x68e   : > { %v1383_v47 = vpop.permute.xlu0 %1382 }
 0x68f   : > { %v1393_v49 = vsel %vm1392_vm3, %v1390_v46, %v1383_v47 }
 0x690   : > { %1908 = vmatprep.mubr.msk.f32.mxu0 %vm433_vm0, %v1393_v49 }
 0x691   : > { %1909 = vmatmul.mubr.msk.f32.vlgmr.msra.gmra.mxu0 %vm433_vm0, %v1394_v50 }
 0x751   : > { %v1910_v54 = vpop.f32.mrf.mxu0 }
 0x752   : > { %v1484_v58 = vadd.f32 %v1910_v54, %v1770_v55 }
 0x753   : > { %v1478_v56 = vpop.f32.mrf.mxu0 }
 0x754   : > { %v1479_v57 = vadd.f32 %v1770_v55, %v1478_v56 }
 0x756   : > { %1919 = vmatprep.mubr.msk.f32.mxu1 %vm433_vm0, %v1479_v57 }
 0x757   : > { %1920 = vmatmul.mubr.msk.f32.vlgmr.msra.gmra.mxu1 %vm433_vm0, %v1484_v58 }
 0x817   : > { %v1921_v60 = vpop.f32.mrf.mxu1 }
 0x818   : > { %v1576_v61 = vadd.f32 %v1921_v60, %v1773_v59 }
 0x819   : > { %v1570_v62 = vpop.f32.mrf.mxu1 }
 0x81a   : > { %v1580_v63 = vadd.f32 %v1576_v61, %v2534_v1  ;;  %v1571_v2 = vadd.f32 %v1773_v59, %v1570_v62 }
 0x81c   : > { %1582 = vst.msk [vmem:[%s426_s19 + $0x8] sm:$0xff] %vm433_vm0, %v1580_v63  ;;  %v1579_v3 = vadd.f32 %v1571_v2, %v2532_v0 }
 0x81e   : > { %1581 = vst.msk [vmem:[%s426_s19] sm:$0xff] %vm433_vm0, %v1579_v3 }
 0x81f   : > { %2217 = shalt.err (!%p2214_p5)
}
 0x820   : > { %s2218_s27 = scalar_lea.hbm %s2689_s22, 256  ;;  %s2222_s5 = scalar_lea.hbm %s2752_s9, 512 }
 0x821   : > { %p2219_p10 = scmp.ne.s32.totalorder %s2689_s22, %s2218_s27  ;;  %p2223_p6 = scmp.lt.s32.totalorder %s2689_s22, %s2752_s9 }
 0x822   : > { %p2224_p3 = scmp.lt.s32.totalorder %s2222_s5, %s2218_s27 }
 0x823   : > { %p2220_p12 = pnand %p2219_p10, %p2484_p0 }
 0x824   : > { %p2225_p9 = por %p2224_p3, %p2223_p6 }
 0x825   : > { %p2221_p7 = pneg %p2220_p12 }
 0x827   : > { %p2226_p1 = pnand %p2225_p9, %p2221_p7 }
 0x829   : > { %2229 = shalt.err (!%p2226_p1)
}
 0x82a   : > { %s2310_s16 = smov 128  }
 0x82b   : > { %1940 = dma.vmem_to_hbm [thread:$0]  (%p2484_p0), %s2693_s21, 256, %s2689_s22, %s1584_s12, %s2310_s16, %s2310_s16, %s2306_s15  }
 0x82c PF: > { %s2775_s18 = sld [smem:[#allocation16_spill]]  ;;  %s1614_s7 = sand.u32 1, %s2272_s30  }
 0x82d   : > { %p2777_p8 = scmp.ge.s32.totalorder %s2292_s14, 2  ;;  %s1615_s24 = scalar_lea.sflag [#allocation4], %s1614_s7 }
 0x832   : > { %p2776_p4 = scmp.ne.s32.totalorder %s2775_s18, 0 }
 0x834   : > { %p1960_p13 = pnand %p2777_p8, %p2776_p4 }
 0x836   : > { %p1961_p11 = pneg %p1960_p13 }
 0x838   : > { %2267 = dma.done.wait (%p1961_p11), %s1615_s24, 256  }
 0x839   : > { %2269 = vsyncadd (%p1961_p11), %s1615_s24, 4294967040  ;;  %s27_s14 = sadd.s32 1, %s2292_s14   ;;  %s2778_s30 = smov %s2276_s10 }
 0x83a   : > { %p24_p2 = scmp.ge.s32.totalorder %s27_s14, 4   ;;  %s2779_s10 = smov %s2280_s11 }
 0x83b   : > { %s2780_s11 = smov %s2493_s28  ;;  %s2781_s12 = smov %s2288_s13 }
 0x83c   : > { %s2782_s13 = smov %s2784_s23  ;;  %26 = sbr.rel (!%p24_p2) target bundleno = 13 (0xd), region = 117 }
 0x841   :  { %1620 = vsyncpa [#allocation3], 1 }
 0x842   :  { %1622 = vsyncpa [#allocation3 + $0x1], 1 }
 0x843   :  { %1623 = vsyncpa [#allocation6], 1 }
 0x844   :  { %1624 = vsyncpa [#allocation9], 1 }
 0x845   :  { %1625 = vsyncpa [#allocation4], 1 }
 0x846   :  { %1627 = vsyncpa [#allocation4 + $0x1], 1 }

</bundles_post_ra>
